<compile_context>
chip_gen: v6e
topology: v6e:2x2x1
jax: 0.10.0
libtpu: 0.0.40
codegen_flags: <defaults>
</compile_context>

<pallas_src>
import jax
import jax.numpy as jnp
from jax.experimental import pallas as pl
from jax.experimental.pallas import tpu as pltpu


# -----------------------------------------------------------------------------
# Pallas kernel: single-layer unidirectional LSTM + fused K-head linear output
# -----------------------------------------------------------------------------
def lstm_multilabel_kernel(emb_ref, wih_ref, whh_ref, b_ref, fcw_ref, fcb_ref,
                           out_ref, proj_ref):
    # emb_ref  : (T, Bp, E)    time-major embedded sequence (batch padded)
    # wih_ref  : (E, 4H)       input->gates weight (transposed)
    # whh_ref  : (H, 4H)       hidden->gates weight (transposed)
    # b_ref    : (1, 4H)       b_ih + b_hh combined
    # fcw_ref  : (H, KOp)      all K heads packed & lane-padded
    # fcb_ref  : (1, KOp)      packed head biases (padded)
    # out_ref  : (Bp, KOp)     fused head outputs (lane-dense store)
    # proj_ref : (T, Bp, 4H)   VMEM scratch for the hoisted input projection
    T, Bp, E = emb_ref.shape
    H = whh_ref.shape[0]
    G = 4 * H

    wih = wih_ref[...]
    whh = whh_ref[...]
    b = b_ref[...]                                     # (1, 4H)

    # ---- prologue: hoist x@W_ih + b out of the recurrence (one big matmul) --
    x_flat = emb_ref[...].reshape(T * Bp, E)           # tile-aligned collapse
    proj = jnp.dot(x_flat, wih, preferred_element_type=jnp.float32) + b
    proj_ref[...] = proj.reshape(T, Bp, G)

    h0 = jnp.zeros((Bp, H), dtype=jnp.float32)
    c0 = jnp.zeros((Bp, H), dtype=jnp.float32)

    def step(t, carry):
        h, c = carry
        # Only the hidden matmul + one VMEM load remain on the critical path.
        gates = proj_ref[t] + jnp.dot(h, whh,
                                      preferred_element_type=jnp.float32)
        sig = jax.nn.sigmoid(gates)                    # 1 full-vreg EUP pass
        tnh = jnp.tanh(gates)                          # 1 full-vreg EUP pass
        i_g = sig[:, 0 * H:1 * H]
        f_g = sig[:, 1 * H:2 * H]
        g_g = tnh[:, 2 * H:3 * H]
        o_g = sig[:, 3 * H:4 * H]
        c_new = f_g * c + i_g * g_g
        h_new = o_g * jnp.tanh(c_new)
        return (h_new, c_new)

    # T is static & small -> fully unroll so adjacent steps interleave.
    h_n, _ = jax.lax.fori_loop(0, T, step, (h0, c0), unroll=True)  # (Bp, H)

    # ---- epilogue: all K heads as one matmul + one unmasked lane-dense store -
    out_ref[...] = (jnp.dot(h_n, fcw_ref[...],
                            preferred_element_type=jnp.float32)
                    + fcb_ref[...])


# -----------------------------------------------------------------------------
# Wrapper
# -----------------------------------------------------------------------------
def lstm_multilabel_forward(x_tokens, params):
    """x_tokens: int32 (B, T) token ids.  Returns list of K=(output_size)
    arrays of shape (B, output_size), matching the PyTorch module."""
    emb_table = params["embedding"]          # (V, E)
    w_ih_t = params["w_ih_t"]                # (E, 4H)
    w_hh_t = params["w_hh_t"]                # (H, 4H)
    b_gates = params["b_gates"]              # (1, 4H)
    fc_w = params["fc_w"]                    # (K, H, O)
    fc_b = params["fc_b"]                    # (K, O)

    B, T = x_tokens.shape
    E = emb_table.shape[1]
    H = w_hh_t.shape[0]
    K, _, O = fc_w.shape

    # Pad batch up to a multiple of 8 sublanes (f32).
    Bp = max(8, ((B + 7) // 8) * 8)
    # Pad the fused head output dim up to a multiple of 128 lanes.
    KO = K * O
    KOp = max(128, ((KO + 127) // 128) * 128)

    # Embedding lookup (glue), time-major + batch padding for the kernel.
    embedded = jnp.take(emb_table, x_tokens, axis=0)        # (B, T, E)
    emb_tm = jnp.transpose(embedded, (1, 0, 2))             # (T, B, E)
    emb_tm = jnp.pad(emb_tm, ((0, 0), (0, Bp - B), (0, 0)))  # (T, Bp, E)

    # Pack K heads into one (H, K*O) matrix, zero-pad lanes to KOp.
    fcw_packed = jnp.transpose(fc_w, (1, 0, 2)).reshape(H, KO)   # (H, K*O)
    fcw_packed = jnp.pad(fcw_packed, ((0, 0), (0, KOp - KO)))    # (H, KOp)
    fcb_packed = jnp.pad(fc_b.reshape(1, KO), ((0, 0), (0, KOp - KO)))

    out = pl.pallas_call(
        lstm_multilabel_kernel,
        out_shape=jax.ShapeDtypeStruct((Bp, KOp), jnp.float32),
        grid=(1,),
        in_specs=[
            pl.BlockSpec((T, Bp, E), lambda i: (0, 0, 0)),
            pl.BlockSpec((E, 4 * H), lambda i: (0, 0)),
            pl.BlockSpec((H, 4 * H), lambda i: (0, 0)),
            pl.BlockSpec((1, 4 * H), lambda i: (0, 0)),
            pl.BlockSpec((H, KOp), lambda i: (0, 0)),
            pl.BlockSpec((1, KOp), lambda i: (0, 0)),
        ],
        out_specs=pl.BlockSpec((Bp, KOp), lambda i: (0, 0)),
        scratch_shapes=[pltpu.VMEM((T, Bp, 4 * H), jnp.float32)],
        compiler_params=pltpu.CompilerParams(
            dimension_semantics=("arbitrary",)),
    )(emb_tm, w_ih_t, w_hh_t, b_gates, fcw_packed, fcb_packed)

    # Drop batch padding / lane padding and split per head.
    return [out[:B, k * O:(k + 1) * O] for k in range(K)]


# -----------------------------------------------------------------------------
# Pure-JAX reference (same math) for a correctness check
# -----------------------------------------------------------------------------
def reference_forward(x_tokens, params):
    emb_table = params["embedding"]
    w_ih_t = params["w_ih_t"]
    w_hh_t = params["w_hh_t"]
    b_gates = params["b_gates"]
    fc_w = params["fc_w"]
    fc_b = params["fc_b"]

    H = w_hh_t.shape[0]
    embedded = jnp.take(emb_table, x_tokens, axis=0)   # (B, T, E)
    B, T, _ = embedded.shape
    h = jnp.zeros((B, H), jnp.float32)
    c = jnp.zeros((B, H), jnp.float32)
    for t in range(T):
        gates = embedded[:, t, :] @ w_ih_t + h @ w_hh_t + b_gates
        i_g = jax.nn.sigmoid(gates[:, 0 * H:1 * H])
        f_g = jax.nn.sigmoid(gates[:, 1 * H:2 * H])
        g_g = jnp.tanh(gates[:, 2 * H:3 * H])
        o_g = jax.nn.sigmoid(gates[:, 3 * H:4 * H])
        c = f_g * c + i_g * g_g
        h = o_g * jnp.tanh(c)
    return [h @ fc_w[k] + fc_b[k] for k in range(fc_w.shape[0])]


# -----------------------------------------------------------------------------
# Deterministic parameter construction (synthetic; mimics module __init__ shapes)
# -----------------------------------------------------------------------------
def init_params(key, vocab_size, embedding_size, hidden_size, output_size):
    ks = jax.random.split(key, 6)
    scale = 1.0 / jnp.sqrt(hidden_size)
    emb = jax.random.normal(ks[0], (vocab_size, embedding_size), jnp.float32)
    w_ih = jax.random.uniform(ks[1], (4 * hidden_size, embedding_size),
                              jnp.float32, -scale, scale)
    w_hh = jax.random.uniform(ks[2], (4 * hidden_size, hidden_size),
                              jnp.float32, -scale, scale)
    b_ih = jax.random.uniform(ks[3], (4 * hidden_size,), jnp.float32,
                              -scale, scale)
    b_hh = jax.random.uniform(ks[4], (4 * hidden_size,), jnp.float32,
                              -scale, scale)
    # output_size heads, each Linear(hidden_size -> output_size)
    fc_scale = 1.0 / jnp.sqrt(hidden_size)
    fck = jax.random.split(ks[5], 2)
    fc_w = jax.random.uniform(fck[0],
                              (output_size, hidden_size, output_size),
                              jnp.float32, -fc_scale, fc_scale)
    fc_b = jax.random.uniform(fck[1], (output_size, output_size),
                              jnp.float32, -fc_scale, fc_scale)
    return {
        "embedding": emb,
        "w_ih_t": w_ih.T,                            # (E, 4H)
        "w_hh_t": w_hh.T,                            # (H, 4H)
        "b_gates": (b_ih + b_hh)[None, :],           # (1, 4H)
        "fc_w": fc_w,                                # (K, H, O)
        "fc_b": fc_b,                                # (K, O)
    }


if __name__ == "__main__":
    # Small, module-consistent shapes.
    vocab_size = 50
    embedding_size = 16
    hidden_size = 32
    output_size = 4
    batch = 2
    seq = 8

    key = jax.random.PRNGKey(0)
    k_param, k_data = jax.random.split(key)
    params = init_params(k_param, vocab_size, embedding_size, hidden_size,
                         output_size)
    x = jax.random.randint(k_data, (batch, seq), 0, vocab_size, jnp.int32)

    outs = lstm_multilabel_forward(x, params)
    outs = [jax.block_until_ready(o) for o in outs]

    refs = reference_forward(x, params)
    for o, r in zip(outs, refs):
        assert o.shape == (batch, output_size)
        assert jnp.allclose(o, r, atol=1e-4, rtol=1e-4), "mismatch vs reference"

    print("KERNEL_OK")
</pallas_src>

<mosaic_0001>
module attributes {stable_mosaic.version = 11 : i64} {
  func.func @lstm_multilabel_kernel(%arg0: i32, %arg1: memref<8x8x16xf32, #tpu.memory_space<vmem>>, %arg2: memref<16x128xf32, #tpu.memory_space<vmem>>, %arg3: memref<32x128xf32, #tpu.memory_space<vmem>>, %arg4: memref<1x128xf32, #tpu.memory_space<vmem>>, %arg5: memref<32x128xf32, #tpu.memory_space<vmem>>, %arg6: memref<1x128xf32, #tpu.memory_space<vmem>>, %arg7: memref<8x128xf32, #tpu.memory_space<vmem>>, %arg8: memref<8x8x128xf32, #tpu.memory_space<vmem>>) attributes {dimension_semantics = [#tpu.dimension_semantics<arbitrary>], iteration_bounds = array<i64: 1>, scalar_prefetch = 0 : i64, scratch_operands = 1 : i64, tpu.core_type = #tpu.core_type<tc>, window_params = [{pipeline_mode = #tpu.pipeline_mode<synchronous>, transform_indices = @transform_0, window_bounds = array<i64: 8, 8, 16>}, {pipeline_mode = #tpu.pipeline_mode<synchronous>, transform_indices = @transform_1, window_bounds = array<i64: 16, 128>}, {pipeline_mode = #tpu.pipeline_mode<synchronous>, transform_indices = @transform_2, window_bounds = array<i64: 32, 128>}, {pipeline_mode = #tpu.pipeline_mode<synchronous>, transform_indices = @transform_3, window_bounds = array<i64: 1, 128>}, {pipeline_mode = #tpu.pipeline_mode<synchronous>, transform_indices = @transform_4, window_bounds = array<i64: 32, 128>}, {pipeline_mode = #tpu.pipeline_mode<synchronous>, transform_indices = @transform_5, window_bounds = array<i64: 1, 128>}, {pipeline_mode = #tpu.pipeline_mode<synchronous>, transform_indices = @transform_6, window_bounds = array<i64: 8, 128>}]} {
    %c0 = arith.constant 0 : index
    %c0_0 = arith.constant 0 : index
    %0 = vector.load %arg2[%c0, %c0_0] : memref<16x128xf32, #tpu.memory_space<vmem>>, vector<16x128xf32>
    %c0_1 = arith.constant 0 : index
    %c0_2 = arith.constant 0 : index
    %1 = vector.load %arg3[%c0_1, %c0_2] : memref<32x128xf32, #tpu.memory_space<vmem>>, vector<32x128xf32>
    %c0_3 = arith.constant 0 : index
    %c0_4 = arith.constant 0 : index
    %2 = vector.load %arg4[%c0_3, %c0_4] : memref<1x128xf32, #tpu.memory_space<vmem>>, vector<1x128xf32>
    %c0_5 = arith.constant 0 : index
    %c0_6 = arith.constant 0 : index
    %c0_7 = arith.constant 0 : index
    %3 = vector.load %arg1[%c0_5, %c0_6, %c0_7] : memref<8x8x16xf32, #tpu.memory_space<vmem>>, vector<8x8x16xf32>
    %4 = vector.shape_cast %3 : vector<8x8x16xf32> to vector<64x16xf32>
    %cst = arith.constant dense<0.000000e+00> : vector<64x128xf32>
    %5 = tpu.matmul %4, %0, %cst {dimension_numbers = #tpu.dot_dimension_numbers<[1], [0], [0], [1], [0, 0, 1, 1], [], []>} : vector<64x16xf32>, vector<16x128xf32>, vector<64x128xf32> -> vector<64x128xf32>
    %6 = vector.broadcast %2 : vector<1x128xf32> to vector<64x128xf32>
    %7 = arith.addf %5, %6 : vector<64x128xf32>
    %8 = vector.shape_cast %7 : vector<64x128xf32> to vector<8x8x128xf32>
    %c0_8 = arith.constant 0 : index
    %c0_9 = arith.constant 0 : index
    %c0_10 = arith.constant 0 : index
    %9 = vector.load %arg8[%c0_8, %c0_9, %c0_10] : memref<8x8x128xf32, #tpu.memory_space<vmem>>, vector<8x8x128xf32>
    tpu.vector_store %arg8[%c0_8, %c0_9, %c0_10], %8 {strides = array<i32>} : memref<8x8x128xf32, #tpu.memory_space<vmem>>, vector<8x8x128xf32>,
    %cst_11 = arith.constant 0.000000e+00 : f32
    %10 = vector.broadcast %cst_11 : f32 to vector<8x32xf32>
    %cst_12 = arith.constant 0.000000e+00 : f32
    %11 = vector.broadcast %cst_12 : f32 to vector<8x32xf32>
    %c0_i32 = arith.constant 0 : i32
    %12 = arith.index_cast %c0_i32 : i32 to index
    %c0_13 = arith.constant 0 : index
    %c0_14 = arith.constant 0 : index
    %13 = vector.load %arg8[%12, %c0_13, %c0_14] : memref<8x8x128xf32, #tpu.memory_space<vmem>>, vector<1x8x128xf32>
    %14 = vector.shape_cast %13 : vector<1x8x128xf32> to vector<8x128xf32>
    %cst_15 = arith.constant dense<0.000000e+00> : vector<8x128xf32>
    %15 = tpu.matmul %10, %1, %cst_15 {dimension_numbers = #tpu.dot_dimension_numbers<[1], [0], [0], [1], [0, 0, 1, 1], [], []>} : vector<8x32xf32>, vector<32x128xf32>, vector<8x128xf32> -> vector<8x128xf32>
    %16 = arith.addf %14, %15 : vector<8x128xf32>
    %17 = arith.negf %16 : vector<8x128xf32>
    %18 = math.exp %17 : vector<8x128xf32>
    %cst_16 = arith.constant 1.000000e+00 : f32
    %19 = vector.broadcast %cst_16 : f32 to vector<8x128xf32>
    %20 = arith.addf %19, %18 : vector<8x128xf32>
    %21 = arith.divf %19, %20 : vector<8x128xf32>
    %22 = math.tanh %16 : vector<8x128xf32>
    %23 = vector.extract_strided_slice %21 {offsets = [0, 0], sizes = [8, 32], strides = [1, 1]} : vector<8x128xf32> to vector<8x32xf32>
    %24 = vector.extract_strided_slice %21 {offsets = [0, 32], sizes = [8, 32], strides = [1, 1]} : vector<8x128xf32> to vector<8x32xf32>
    %25 = vector.extract_strided_slice %22 {offsets = [0, 64], sizes = [8, 32], strides = [1, 1]} : vector<8x128xf32> to vector<8x32xf32>
    %26 = vector.extract_strided_slice %21 {offsets = [0, 96], sizes = [8, 32], strides = [1, 1]} : vector<8x128xf32> to vector<8x32xf32>
    %27 = arith.mulf %24, %11 : vector<8x32xf32>
    %28 = arith.mulf %23, %25 : vector<8x32xf32>
    %29 = arith.addf %27, %28 : vector<8x32xf32>
    %30 = math.tanh %29 : vector<8x32xf32>
    %31 = arith.mulf %26, %30 : vector<8x32xf32>
    %c1_i32 = arith.constant 1 : i32
    %32 = arith.index_cast %c1_i32 : i32 to index
    %c0_17 = arith.constant 0 : index
    %c0_18 = arith.constant 0 : index
    %33 = vector.load %arg8[%32, %c0_17, %c0_18] : memref<8x8x128xf32, #tpu.memory_space<vmem>>, vector<1x8x128xf32>
    %34 = vector.shape_cast %33 : vector<1x8x128xf32> to vector<8x128xf32>
    %cst_19 = arith.constant dense<0.000000e+00> : vector<8x128xf32>
    %35 = tpu.matmul %31, %1, %cst_19 {dimension_numbers = #tpu.dot_dimension_numbers<[1], [0], [0], [1], [0, 0, 1, 1], [], []>} : vector<8x32xf32>, vector<32x128xf32>, vector<8x128xf32> -> vector<8x128xf32>
    %36 = arith.addf %34, %35 : vector<8x128xf32>
    %37 = arith.negf %36 : vector<8x128xf32>
    %38 = math.exp %37 : vector<8x128xf32>
    %cst_20 = arith.constant 1.000000e+00 : f32
    %39 = vector.broadcast %cst_20 : f32 to vector<8x128xf32>
    %40 = arith.addf %39, %38 : vector<8x128xf32>
    %41 = arith.divf %39, %40 : vector<8x128xf32>
    %42 = math.tanh %36 : vector<8x128xf32>
    %43 = vector.extract_strided_slice %41 {offsets = [0, 0], sizes = [8, 32], strides = [1, 1]} : vector<8x128xf32> to vector<8x32xf32>
    %44 = vector.extract_strided_slice %41 {offsets = [0, 32], sizes = [8, 32], strides = [1, 1]} : vector<8x128xf32> to vector<8x32xf32>
    %45 = vector.extract_strided_slice %42 {offsets = [0, 64], sizes = [8, 32], strides = [1, 1]} : vector<8x128xf32> to vector<8x32xf32>
    %46 = vector.extract_strided_slice %41 {offsets = [0, 96], sizes = [8, 32], strides = [1, 1]} : vector<8x128xf32> to vector<8x32xf32>
    %47 = arith.mulf %44, %29 : vector<8x32xf32>
    %48 = arith.mulf %43, %45 : vector<8x32xf32>
    %49 = arith.addf %47, %48 : vector<8x32xf32>
    %50 = math.tanh %49 : vector<8x32xf32>
    %51 = arith.mulf %46, %50 : vector<8x32xf32>
    %c2_i32 = arith.constant 2 : i32
    %52 = arith.index_cast %c2_i32 : i32 to index
    %c0_21 = arith.constant 0 : index
    %c0_22 = arith.constant 0 : index
    %53 = vector.load %arg8[%52, %c0_21, %c0_22] : memref<8x8x128xf32, #tpu.memory_space<vmem>>, vector<1x8x128xf32>
    %54 = vector.shape_cast %53 : vector<1x8x128xf32> to vector<8x128xf32>
    %cst_23 = arith.constant dense<0.000000e+00> : vector<8x128xf32>
    %55 = tpu.matmul %51, %1, %cst_23 {dimension_numbers = #tpu.dot_dimension_numbers<[1], [0], [0], [1], [0, 0, 1, 1], [], []>} : vector<8x32xf32>, vector<32x128xf32>, vector<8x128xf32> -> vector<8x128xf32>
    %56 = arith.addf %54, %55 : vector<8x128xf32>
    %57 = arith.negf %56 : vector<8x128xf32>
    %58 = math.exp %57 : vector<8x128xf32>
    %cst_24 = arith.constant 1.000000e+00 : f32
    %59 = vector.broadcast %cst_24 : f32 to vector<8x128xf32>
    %60 = arith.addf %59, %58 : vector<8x128xf32>
    %61 = arith.divf %59, %60 : vector<8x128xf32>
    %62 = math.tanh %56 : vector<8x128xf32>
    %63 = vector.extract_strided_slice %61 {offsets = [0, 0], sizes = [8, 32], strides = [1, 1]} : vector<8x128xf32> to vector<8x32xf32>
    %64 = vector.extract_strided_slice %61 {offsets = [0, 32], sizes = [8, 32], strides = [1, 1]} : vector<8x128xf32> to vector<8x32xf32>
    %65 = vector.extract_strided_slice %62 {offsets = [0, 64], sizes = [8, 32], strides = [1, 1]} : vector<8x128xf32> to vector<8x32xf32>
    %66 = vector.extract_strided_slice %61 {offsets = [0, 96], sizes = [8, 32], strides = [1, 1]} : vector<8x128xf32> to vector<8x32xf32>
    %67 = arith.mulf %64, %49 : vector<8x32xf32>
    %68 = arith.mulf %63, %65 : vector<8x32xf32>
    %69 = arith.addf %67, %68 : vector<8x32xf32>
    %70 = math.tanh %69 : vector<8x32xf32>
    %71 = arith.mulf %66, %70 : vector<8x32xf32>
    %c3_i32 = arith.constant 3 : i32
    %72 = arith.index_cast %c3_i32 : i32 to index
    %c0_25 = arith.constant 0 : index
    %c0_26 = arith.constant 0 : index
    %73 = vector.load %arg8[%72, %c0_25, %c0_26] : memref<8x8x128xf32, #tpu.memory_space<vmem>>, vector<1x8x128xf32>
    %74 = vector.shape_cast %73 : vector<1x8x128xf32> to vector<8x128xf32>
    %cst_27 = arith.constant dense<0.000000e+00> : vector<8x128xf32>
    %75 = tpu.matmul %71, %1, %cst_27 {dimension_numbers = #tpu.dot_dimension_numbers<[1], [0], [0], [1], [0, 0, 1, 1], [], []>} : vector<8x32xf32>, vector<32x128xf32>, vector<8x128xf32> -> vector<8x128xf32>
    %76 = arith.addf %74, %75 : vector<8x128xf32>
    %77 = arith.negf %76 : vector<8x128xf32>
    %78 = math.exp %77 : vector<8x128xf32>
    %cst_28 = arith.constant 1.000000e+00 : f32
    %79 = vector.broadcast %cst_28 : f32 to vector<8x128xf32>
    %80 = arith.addf %79, %78 : vector<8x128xf32>
    %81 = arith.divf %79, %80 : vector<8x128xf32>
    %82 = math.tanh %76 : vector<8x128xf32>
    %83 = vector.extract_strided_slice %81 {offsets = [0, 0], sizes = [8, 32], strides = [1, 1]} : vector<8x128xf32> to vector<8x32xf32>
    %84 = vector.extract_strided_slice %81 {offsets = [0, 32], sizes = [8, 32], strides = [1, 1]} : vector<8x128xf32> to vector<8x32xf32>
    %85 = vector.extract_strided_slice %82 {offsets = [0, 64], sizes = [8, 32], strides = [1, 1]} : vector<8x128xf32> to vector<8x32xf32>
    %86 = vector.extract_strided_slice %81 {offsets = [0, 96], sizes = [8, 32], strides = [1, 1]} : vector<8x128xf32> to vector<8x32xf32>
    %87 = arith.mulf %84, %69 : vector<8x32xf32>
    %88 = arith.mulf %83, %85 : vector<8x32xf32>
    %89 = arith.addf %87, %88 : vector<8x32xf32>
    %90 = math.tanh %89 : vector<8x32xf32>
    %91 = arith.mulf %86, %90 : vector<8x32xf32>
    %c4_i32 = arith.constant 4 : i32
    %92 = arith.index_cast %c4_i32 : i32 to index
    %c0_29 = arith.constant 0 : index
    %c0_30 = arith.constant 0 : index
    %93 = vector.load %arg8[%92, %c0_29, %c0_30] : memref<8x8x128xf32, #tpu.memory_space<vmem>>, vector<1x8x128xf32>
    %94 = vector.shape_cast %93 : vector<1x8x128xf32> to vector<8x128xf32>
    %cst_31 = arith.constant dense<0.000000e+00> : vector<8x128xf32>
    %95 = tpu.matmul %91, %1, %cst_31 {dimension_numbers = #tpu.dot_dimension_numbers<[1], [0], [0], [1], [0, 0, 1, 1], [], []>} : vector<8x32xf32>, vector<32x128xf32>, vector<8x128xf32> -> vector<8x128xf32>
    %96 = arith.addf %94, %95 : vector<8x128xf32>
    %97 = arith.negf %96 : vector<8x128xf32>
    %98 = math.exp %97 : vector<8x128xf32>
    %cst_32 = arith.constant 1.000000e+00 : f32
    %99 = vector.broadcast %cst_32 : f32 to vector<8x128xf32>
    %100 = arith.addf %99, %98 : vector<8x128xf32>
    %101 = arith.divf %99, %100 : vector<8x128xf32>
    %102 = math.tanh %96 : vector<8x128xf32>
    %103 = vector.extract_strided_slice %101 {offsets = [0, 0], sizes = [8, 32], strides = [1, 1]} : vector<8x128xf32> to vector<8x32xf32>
    %104 = vector.extract_strided_slice %101 {offsets = [0, 32], sizes = [8, 32], strides = [1, 1]} : vector<8x128xf32> to vector<8x32xf32>
    %105 = vector.extract_strided_slice %102 {offsets = [0, 64], sizes = [8, 32], strides = [1, 1]} : vector<8x128xf32> to vector<8x32xf32>
    %106 = vector.extract_strided_slice %101 {offsets = [0, 96], sizes = [8, 32], strides = [1, 1]} : vector<8x128xf32> to vector<8x32xf32>
    %107 = arith.mulf %104, %89 : vector<8x32xf32>
    %108 = arith.mulf %103, %105 : vector<8x32xf32>
    %109 = arith.addf %107, %108 : vector<8x32xf32>
    %110 = math.tanh %109 : vector<8x32xf32>
    %111 = arith.mulf %106, %110 : vector<8x32xf32>
    %c5_i32 = arith.constant 5 : i32
    %112 = arith.index_cast %c5_i32 : i32 to index
    %c0_33 = arith.constant 0 : index
    %c0_34 = arith.constant 0 : index
    %113 = vector.load %arg8[%112, %c0_33, %c0_34] : memref<8x8x128xf32, #tpu.memory_space<vmem>>, vector<1x8x128xf32>
    %114 = vector.shape_cast %113 : vector<1x8x128xf32> to vector<8x128xf32>
    %cst_35 = arith.constant dense<0.000000e+00> : vector<8x128xf32>
    %115 = tpu.matmul %111, %1, %cst_35 {dimension_numbers = #tpu.dot_dimension_numbers<[1], [0], [0], [1], [0, 0, 1, 1], [], []>} : vector<8x32xf32>, vector<32x128xf32>, vector<8x128xf32> -> vector<8x128xf32>
    %116 = arith.addf %114, %115 : vector<8x128xf32>
    %117 = arith.negf %116 : vector<8x128xf32>
    %118 = math.exp %117 : vector<8x128xf32>
    %cst_36 = arith.constant 1.000000e+00 : f32
    %119 = vector.broadcast %cst_36 : f32 to vector<8x128xf32>
    %120 = arith.addf %119, %118 : vector<8x128xf32>
    %121 = arith.divf %119, %120 : vector<8x128xf32>
    %122 = math.tanh %116 : vector<8x128xf32>
    %123 = vector.extract_strided_slice %121 {offsets = [0, 0], sizes = [8, 32], strides = [1, 1]} : vector<8x128xf32> to vector<8x32xf32>
    %124 = vector.extract_strided_slice %121 {offsets = [0, 32], sizes = [8, 32], strides = [1, 1]} : vector<8x128xf32> to vector<8x32xf32>
    %125 = vector.extract_strided_slice %122 {offsets = [0, 64], sizes = [8, 32], strides = [1, 1]} : vector<8x128xf32> to vector<8x32xf32>
    %126 = vector.extract_strided_slice %121 {offsets = [0, 96], sizes = [8, 32], strides = [1, 1]} : vector<8x128xf32> to vector<8x32xf32>
    %127 = arith.mulf %124, %109 : vector<8x32xf32>
    %128 = arith.mulf %123, %125 : vector<8x32xf32>
    %129 = arith.addf %127, %128 : vector<8x32xf32>
    %130 = math.tanh %129 : vector<8x32xf32>
    %131 = arith.mulf %126, %130 : vector<8x32xf32>
    %c6_i32 = arith.constant 6 : i32
    %132 = arith.index_cast %c6_i32 : i32 to index
    %c0_37 = arith.constant 0 : index
    %c0_38 = arith.constant 0 : index
    %133 = vector.load %arg8[%132, %c0_37, %c0_38] : memref<8x8x128xf32, #tpu.memory_space<vmem>>, vector<1x8x128xf32>
    %134 = vector.shape_cast %133 : vector<1x8x128xf32> to vector<8x128xf32>
    %cst_39 = arith.constant dense<0.000000e+00> : vector<8x128xf32>
    %135 = tpu.matmul %131, %1, %cst_39 {dimension_numbers = #tpu.dot_dimension_numbers<[1], [0], [0], [1], [0, 0, 1, 1], [], []>} : vector<8x32xf32>, vector<32x128xf32>, vector<8x128xf32> -> vector<8x128xf32>
    %136 = arith.addf %134, %135 : vector<8x128xf32>
    %137 = arith.negf %136 : vector<8x128xf32>
    %138 = math.exp %137 : vector<8x128xf32>
    %cst_40 = arith.constant 1.000000e+00 : f32
    %139 = vector.broadcast %cst_40 : f32 to vector<8x128xf32>
    %140 = arith.addf %139, %138 : vector<8x128xf32>
    %141 = arith.divf %139, %140 : vector<8x128xf32>
    %142 = math.tanh %136 : vector<8x128xf32>
    %143 = vector.extract_strided_slice %141 {offsets = [0, 0], sizes = [8, 32], strides = [1, 1]} : vector<8x128xf32> to vector<8x32xf32>
    %144 = vector.extract_strided_slice %141 {offsets = [0, 32], sizes = [8, 32], strides = [1, 1]} : vector<8x128xf32> to vector<8x32xf32>
    %145 = vector.extract_strided_slice %142 {offsets = [0, 64], sizes = [8, 32], strides = [1, 1]} : vector<8x128xf32> to vector<8x32xf32>
    %146 = vector.extract_strided_slice %141 {offsets = [0, 96], sizes = [8, 32], strides = [1, 1]} : vector<8x128xf32> to vector<8x32xf32>
    %147 = arith.mulf %144, %129 : vector<8x32xf32>
    %148 = arith.mulf %143, %145 : vector<8x32xf32>
    %149 = arith.addf %147, %148 : vector<8x32xf32>
    %150 = math.tanh %149 : vector<8x32xf32>
    %151 = arith.mulf %146, %150 : vector<8x32xf32>
    %c7_i32 = arith.constant 7 : i32
    %152 = arith.index_cast %c7_i32 : i32 to index
    %c0_41 = arith.constant 0 : index
    %c0_42 = arith.constant 0 : index
    %153 = vector.load %arg8[%152, %c0_41, %c0_42] : memref<8x8x128xf32, #tpu.memory_space<vmem>>, vector<1x8x128xf32>
    %154 = vector.shape_cast %153 : vector<1x8x128xf32> to vector<8x128xf32>
    %cst_43 = arith.constant dense<0.000000e+00> : vector<8x128xf32>
    %155 = tpu.matmul %151, %1, %cst_43 {dimension_numbers = #tpu.dot_dimension_numbers<[1], [0], [0], [1], [0, 0, 1, 1], [], []>} : vector<8x32xf32>, vector<32x128xf32>, vector<8x128xf32> -> vector<8x128xf32>
    %156 = arith.addf %154, %155 : vector<8x128xf32>
    %157 = arith.negf %156 : vector<8x128xf32>
    %158 = math.exp %157 : vector<8x128xf32>
    %cst_44 = arith.constant 1.000000e+00 : f32
    %159 = vector.broadcast %cst_44 : f32 to vector<8x128xf32>
    %160 = arith.addf %159, %158 : vector<8x128xf32>
    %161 = arith.divf %159, %160 : vector<8x128xf32>
    %162 = math.tanh %156 : vector<8x128xf32>
    %163 = vector.extract_strided_slice %161 {offsets = [0, 0], sizes = [8, 32], strides = [1, 1]} : vector<8x128xf32> to vector<8x32xf32>
    %164 = vector.extract_strided_slice %161 {offsets = [0, 32], sizes = [8, 32], strides = [1, 1]} : vector<8x128xf32> to vector<8x32xf32>
    %165 = vector.extract_strided_slice %162 {offsets = [0, 64], sizes = [8, 32], strides = [1, 1]} : vector<8x128xf32> to vector<8x32xf32>
    %166 = vector.extract_strided_slice %161 {offsets = [0, 96], sizes = [8, 32], strides = [1, 1]} : vector<8x128xf32> to vector<8x32xf32>
    %167 = arith.mulf %164, %149 : vector<8x32xf32>
    %168 = arith.mulf %163, %165 : vector<8x32xf32>
    %169 = arith.addf %167, %168 : vector<8x32xf32>
    %170 = math.tanh %169 : vector<8x32xf32>
    %171 = arith.mulf %166, %170 : vector<8x32xf32>
    %c8_i32 = arith.constant 8 : i32
    %c0_45 = arith.constant 0 : index
    %c0_46 = arith.constant 0 : index
    %172 = vector.load %arg5[%c0_45, %c0_46] : memref<32x128xf32, #tpu.memory_space<vmem>>, vector<32x128xf32>
    %cst_47 = arith.constant dense<0.000000e+00> : vector<8x128xf32>
    %173 = tpu.matmul %171, %172, %cst_47 {dimension_numbers = #tpu.dot_dimension_numbers<[1], [0], [0], [1], [0, 0, 1, 1], [], []>} : vector<8x32xf32>, vector<32x128xf32>, vector<8x128xf32> -> vector<8x128xf32>
    %c0_48 = arith.constant 0 : index
    %c0_49 = arith.constant 0 : index
    %174 = vector.load %arg6[%c0_48, %c0_49] : memref<1x128xf32, #tpu.memory_space<vmem>>, vector<1x128xf32>
    %175 = vector.broadcast %174 : vector<1x128xf32> to vector<8x128xf32>
    %176 = arith.addf %173, %175 : vector<8x128xf32>
    %c0_50 = arith.constant 0 : index
    %c0_51 = arith.constant 0 : index
    %177 = vector.load %arg7[%c0_50, %c0_51] : memref<8x128xf32, #tpu.memory_space<vmem>>, vector<8x128xf32>
    tpu.vector_store %arg7[%c0_50, %c0_51], %176 {strides = array<i32>} : memref<8x128xf32, #tpu.memory_space<vmem>>, vector<8x128xf32>,
    return
  }
  func.func @transform_0(%arg0: i32) -> (i32, i32, i32) {
    %c0_i32 = arith.constant 0 : i32
    %c0_i32_0 = arith.constant 0 : i32
    %c0_i32_1 = arith.constant 0 : i32
    %c0_i32_2 = arith.constant 0 : i32
    return %c0_i32, %c0_i32_0, %c0_i32_1 : i32, i32, i32
  }
  func.func @transform_1(%arg0: i32) -> (i32, i32) {
    %c0_i32 = arith.constant 0 : i32
    %c0_i32_0 = arith.constant 0 : i32
    %c0_i32_1 = arith.constant 0 : i32
    return %c0_i32, %c0_i32_0 : i32, i32
  }
  func.func @transform_2(%arg0: i32) -> (i32, i32) {
    %c0_i32 = arith.constant 0 : i32
    %c0_i32_0 = arith.constant 0 : i32
    %c0_i32_1 = arith.constant 0 : i32
    return %c0_i32, %c0_i32_0 : i32, i32
  }
  func.func @transform_3(%arg0: i32) -> (i32, i32) {
    %c0_i32 = arith.constant 0 : i32
    %c0_i32_0 = arith.constant 0 : i32
    %c0_i32_1 = arith.constant 0 : i32
    return %c0_i32, %c0_i32_0 : i32, i32
  }
  func.func @transform_4(%arg0: i32) -> (i32, i32) {
    %c0_i32 = arith.constant 0 : i32
    %c0_i32_0 = arith.constant 0 : i32
    %c0_i32_1 = arith.constant 0 : i32
    return %c0_i32, %c0_i32_0 : i32, i32
  }
  func.func @transform_5(%arg0: i32) -> (i32, i32) {
    %c0_i32 = arith.constant 0 : i32
    %c0_i32_0 = arith.constant 0 : i32
    %c0_i32_1 = arith.constant 0 : i32
    return %c0_i32, %c0_i32_0 : i32, i32
  }
  func.func @transform_6(%arg0: i32) -> (i32, i32) {
    %c0_i32 = arith.constant 0 : i32
    %c0_i32_0 = arith.constant 0 : i32
    %c0_i32_1 = arith.constant 0 : i32
    return %c0_i32, %c0_i32_0 : i32, i32
  }
}

</mosaic_0001>

<bundles_post_ra>
// kernel: tpu_custom_call.1
= control target key start
LH: loop header
LB: loop body
LE: loop exit
PB: predicated region body
PF: predicated region fallthrough
CT: control target
= control target key end

     0   :  { %11 = vsyncpa [#allocation4], 0  ;;  %s1779_s0 = inlined_call_operand.hbm [shape: f32[8,8,16], index: 0, kind: input, shape index: {}]   ;;  %s1780_s1 = inlined_call_operand.hbm [shape: f32[16,128], index: 1, kind: input, shape index: {}]   ;;  %s1781_s2 = inlined_call_operand.hbm [shape: f32[32,128], index: 2, kind: input, shape index: {}]   ;;  %s1782_s3 = inlined_call_operand.vmem [shape: f32[1,128], index: 3, kind: input, shape index: {}]   ;;  %s1783_s4 = inlined_call_operand.hbm [shape: f32[32,128], index: 4, kind: input, shape index: {}]   ;;  %s1784_s5 = inlined_call_operand.vmem [shape: f32[1,128], index: 5, kind: input, shape index: {}]   ;;  %s1785_s6 = inlined_call_operand.hbm [shape: f32[8,128], index: 6, kind: output, shape index: {}]  }
   0x1   :  { %12 = vsyncpa [#allocation7], 0 }
   0x2   :  { %13 = vsyncpa [#allocation10], 0 }
   0x3   :  { %14 = vsyncpa [#allocation5], 0  ;;  %s1535_s21 = smov [#allocation6]   ;;  %s1536_s23 = smov [#allocation3]  }
   0x4   :  { %s32_s22 = sshll.u32 %s1535_s21, 4  ;;  %s20_s24 = sshll.u32 %s1536_s23, 4  ;;  %s33_s22 = int_to_ptr.vmem [resolvable:$true] %s32_s22  ;;  %s21_s24 = int_to_ptr.vmem [resolvable:$true] %s20_s24 }
   0x5   :  { %s1435_s25 = scalar_lea.vmem %s33_s22, 256  ;;  %p1440_p1 = scmp.lt.s32.totalorder %s33_s22, %s33_s22 }
   0x6   :  { %p1436_p0 = scmp.ne.s32.totalorder %s33_s22, %s1435_s25  ;;  %p1441_p2 = scmp.lt.s32.totalorder %s1435_s25, %s1435_s25 }
   0x8   :  { %p1442_p3 = por %p1441_p2, %p1440_p1 }
   0xa   :  { %p1443_p4 = pnand %p1442_p3, %p1436_p0 }
   0xc   :  { %1446 = shalt.err (!%p1443_p4)
}
   0xd   :  { %s1537_s26 = smov 128   ;;  %s1538_s27 = smov 8  }
   0xe   :  { %38 = dma.hbm_to_vmem [thread:$0]  %s1780_s1, 256, %s33_s22, [#allocation7], %s1537_s26, %s1537_s26, %s1538_s27  }
   0xf   :  { %s1455_s30 = scalar_lea.vmem %s21_s24, 1024  ;;  %p1460_p6 = scmp.lt.s32.totalorder %s21_s24, %s21_s24 }
  0x10   :  { %p1456_p5 = scmp.ne.s32.totalorder %s21_s24, %s1455_s30  ;;  %p1461_p7 = scmp.lt.s32.totalorder %s1455_s30, %s1455_s30 }
  0x12   :  { %p1462_p8 = por %p1461_p7, %p1460_p6 }
  0x14   :  { %p1463_p9 = pnand %p1462_p8, %p1456_p5 }
  0x16   :  { %1466 = shalt.err (!%p1463_p9)
}
  0x17   :  { %26 = dma.hbm_to_vmem [thread:$0]  %s1779_s0, 1024, %s21_s24, [#allocation4], %s1537_s26, %s1537_s26, %s1538_s27  }
  0x18   :  { %s1539_s9 = smov [#allocation8]   ;;  %s1540_s11 = smov [#allocation9]  }
  0x19   :  { %s44_s10 = sshll.u32 %s1539_s9, 4  ;;  %s58_s12 = sshll.u32 %s1540_s11, 4  ;;  %s45_s10 = int_to_ptr.vmem [resolvable:$true] %s44_s10  ;;  %s59_s12 = int_to_ptr.vmem [resolvable:$true] %s58_s12 }
  0x1a   :  { %s1475_s1 = scalar_lea.vmem %s45_s10, 512  ;;  %p1480_p11 = scmp.lt.s32.totalorder %s45_s10, %s45_s10 }
  0x1b   :  { %p1476_p10 = scmp.ne.s32.totalorder %s45_s10, %s1475_s1  ;;  %p1481_p12 = scmp.lt.s32.totalorder %s1475_s1, %s1475_s1 }
  0x1d   :  { %p1482_p13 = por %p1481_p12, %p1480_p11 }
  0x1f   :  { %p1483_p0 = pnand %p1482_p13, %p1476_p10 }
  0x21   :  { %1486 = shalt.err (!%p1483_p0)
}
  0x22   :  { %50 = dma.hbm_to_vmem [thread:$0]  %s1781_s2, 512, %s45_s10, [#allocation7], %s1537_s26, %s1537_s26, %s1538_s27  }
  0x23   :  { %s1495_s0 = scalar_lea.vmem %s59_s12, 512  ;;  %p1500_p2 = scmp.lt.s32.totalorder %s59_s12, %s59_s12 }
  0x24   :  { %p1496_p1 = scmp.ne.s32.totalorder %s59_s12, %s1495_s0  ;;  %p1501_p3 = scmp.lt.s32.totalorder %s1495_s0, %s1495_s0 }
  0x26   :  { %p1502_p4 = por %p1501_p3, %p1500_p2 }
  0x28   :  { %p1503_p5 = pnand %p1502_p4, %p1496_p1 }
  0x2a   :  { %1506 = shalt.err (!%p1503_p5)
}
  0x2b   :  { %64 = dma.hbm_to_vmem [thread:$0]  %s1783_s4, 512, %s59_s12, [#allocation10], %s1537_s26, %s1537_s26, %s1538_s27  }
  0x2c   :  { %1527 = dma.done.wait [#allocation4], 1024  }
  0x2d   :  { %1528 = vsyncadd [#allocation4], 4294966272 }
  0x2e   :  { %1529 = dma.done.wait [#allocation7], 768  }
  0x2f   :  { %1530 = vsyncadd [#allocation7], 4294966528 }
  0x30   :  { %1531 = dma.done.wait [#allocation10], 512  }
  0x31   :  { %1532 = vsyncadd [#allocation10], 4294966784  ;;  %v1541_v0 = vmov 0.0   ;;  %vm1542_vm0 = vmmov 0   ;;  %v80_v1 = vld [vmem:[#allocation6 + $0x8] sm:$0xff]  ;;  %v79_v3 = vld [vmem:[#allocation6] sm:$0xff] }
  0x32   :  { %1253 = vmatprep.subr.mxu1 %v1541_v0  ;;  %1261 = vmatprep.mubr.msk.f32.mxu1 %vm1542_vm0, %v1541_v0  ;;  %v1608_v2 = vld [vmem:[#allocation8 + $0x18] sm:$0xff]  ;;  %v1611_v4 = vld [vmem:[#allocation8 + $0x10] sm:$0xff]  ;;  %vm100_vm1 = vcmask 130048   ;;  %v1615_v7 = vld [vmem:[#allocation8 + $0x8] sm:$0xff]  ;;  %s1543_s17 = smov 64   ;;  %vm239_vm2 = vcmask 261120  }
  0x33   :  { %1237 = vmatprep.subr.mxu0 %v80_v1  ;;  %1254 = vmatpush3.msra.mxu1 %v1608_v2  ;;  %v86_v5 = vld [vmem:[#allocation3] sm:$0xff]  ;;  %v87_v6 = vld [vmem:[#allocation3 + $0x8] sm:$0xff]  ;;  %v1620_v8 = vld [vmem:[#allocation8] sm:$0xff]  ;;  %s1545_s20 = smov [#allocation11]  }
  0x34   :  { %1238 = vmatpush3.msra.mxu0 %v80_v1  ;;  %1255 = vmatprep.subr.mxu1 %v1541_v0  ;;  %v1649_v10 = vld [vmem:[%s1782_s3] ss:$0 sm:$0xff]  ;;  %s1544_s3 = smov 32   ;;  %v88_v44 = vld [vmem:[#allocation3 + $0x10] sm:$0xff]  ;;  %v89_v45 = vld [vmem:[#allocation3 + $0x18] sm:$0xff]  ;;  %s1145_s21 = sshll.u32 %s1545_s20, 4  ;;  %s1146_s21 = int_to_ptr.vmem [resolvable:$true] %s1145_s21 }
  0x35   :  { %1239 = vmatprep.subr.mxu0 %v79_v3  ;;  %1256 = vmatpush3.msra.mxu1 %v1611_v4  ;;  %v90_v46 = vld [vmem:[#allocation3 + $0x20] sm:$0xff]  ;;  %v91_v47 = vld [vmem:[#allocation3 + $0x28] sm:$0xff]  ;;  %v92_v48 = vld [vmem:[#allocation3 + $0x30] sm:$0xff]  ;;  %s1507_s22 = scalar_lea.vmem %s1146_s21, 128  ;;  %p1512_p7 = scmp.lt.s32.totalorder %s1146_s21, %s1146_s21 }
  0x36   :  { %1240 = vmatpush3.msra.mxu0 %v79_v3  ;;  %1241 = vmatprep.mubr.msk.f32.mxu0 %vm100_vm1, %v86_v5  ;;  %v93_v49 = vld [vmem:[#allocation3 + $0x38] sm:$0xff]  ;;  %p1508_p6 = scmp.ne.s32.totalorder %s1146_s21, %s1507_s22  ;;  %p1513_p8 = scmp.lt.s32.totalorder %s1507_s22, %s1507_s22 }
  0x37   :  { %1257 = vmatprep.subr.mxu1 %v1541_v0  ;;  %1242 = vmatmul.mubr.msk.f32.vlgmr.msra.gmra.mxu0 %vm100_vm1, %v87_v6 }
  0x38   :  { %1258 = vmatpush3.msra.mxu1 %v1615_v7  ;;  %1275 = vmatprep.subr.mxu0 %v1541_v0  ;;  %p1514_p9 = por %p1513_p8, %p1512_p7 }
  0x39   :  { %1259 = vmatprep.subr.mxu1 %v1541_v0  ;;  %1276 = vmatpush3.msra.mxu0 %v1608_v2 }
  0x3a   :  { %1260 = vmatpush3.msra.mxu1 %v1620_v8  ;;  %1277 = vmatprep.subr.mxu0 %v1541_v0  ;;  %p1515_p10 = pnand %p1514_p9, %p1508_p6 }
  0x3b   :  { %1262 = vmatmul.mubr.f32.vlgmr.msra.gmra.mxu1 %v1541_v0  ;;  %1264 = vmatprep.subr.mxu1 %v1541_v0 }
  0x3c   :  { %1265 = vmatpush3.msra.mxu1 %v1608_v2  ;;  %1272 = vmatprep.mubr.msk.f32.mxu1 %vm1542_vm0, %v1541_v0 }
  0x3d   :  { %1266 = vmatprep.subr.mxu1 %v1541_v0  ;;  %1278 = vmatpush3.msra.mxu0 %v1611_v4 }
  0x3e   :  { %1267 = vmatpush3.msra.mxu1 %v1611_v4  ;;  %1279 = vmatprep.subr.mxu0 %v1541_v0 }
  0x3f   :  { %1268 = vmatprep.subr.mxu1 %v1541_v0  ;;  %1280 = vmatpush3.msra.mxu0 %v1615_v7 }
  0x40   :  { %1269 = vmatpush3.msra.mxu1 %v1615_v7  ;;  %1281 = vmatprep.subr.mxu0 %v1541_v0 }
  0x41   :  { %1270 = vmatprep.subr.mxu1 %v1541_v0  ;;  %1282 = vmatpush3.msra.mxu0 %v1620_v8 }
  0x42   :  { %1271 = vmatpush3.msra.mxu1 %v1620_v8  ;;  %1297 = vmatprep.subr.mxu0 %v1541_v0 }
  0x43   :  { %1286 = vmatprep.subr.mxu1 %v1541_v0  ;;  %1244 = vmatprep.mubr.msk.f32.mxu0 %vm100_vm1, %v88_v44 }
  0x44   :  { %1245 = vmatmul.mubr.msk.f32.gmra.mxu0 %vm100_vm1, %v89_v45 }
  0x45   :  { %1247 = vmatprep.mubr.msk.f32.mxu0 %vm100_vm1, %v90_v46 }
  0x48   :  { %1248 = vmatmul.mubr.msk.f32.gmra.mxu0 %vm100_vm1, %v91_v47 }
  0x49   :  { %1250 = vmatprep.mubr.msk.f32.mxu0 %vm100_vm1, %v92_v48 }
  0x4c   :  { %1251 = vmatmul.mubr.msk.f32.gmra.mxu0 %vm100_vm1, %v93_v49 }
  0x4d   :  { %1283 = vmatprep.mubr.msk.f32.mxu0 %vm1542_vm0, %v1541_v0 }
  0xf7   :  { %v1243_v9 = vpop.f32.mrf.mxu0 }
  0xf8   :  { %v197_v30 = vadd.f32 %v1243_v9, %v1649_v10 }
  0xf9   :  { %v191_v11 = vpop.f32.mrf.mxu0 }
  0xfa   :  { %v192_v12 = vadd.f32 %v1649_v10, %v191_v11 }
  0xfb   :  { %v309_v13 = vpop.f32.mrf.mxu1 }
  0xfc   :  { %v313_v14 = vadd.f32 %v309_v13, %v192_v12 }
  0xfd   :  { %v1263_v15 = vpop.f32.mrf.mxu1 }
  0xfe   :  { %1363 = vtanh.f32 %v313_v14  ;;  %v1165_v17 = vmul.f32 -1.442695, %v313_v14 }
 0x100   :  { %1365 = vpow2.f32 %v1165_v17 }
 0x104   :  { %v1246_v54 = vpop.f32.mrf.mxu0 }
 0x106   :  { %v201_v55 = vpop.f32.mrf.mxu0 }
 0x107   :  { %v202_v60 = vadd.f32 %v1649_v10, %v201_v55 }
 0x108   :  { %v1691_v56 = vpop.f32.mrf.mxu0 }
 0x10a   :  { %v1693_v57 = vpop.f32.mrf.mxu0 }
 0x10b   :  { %v1364_v16 = vpop.eup %1363 }
 0x10c   :  { %323 = vrot.lane.b32.xlu0 %v1364_v16, %s1543_s17  ;;  %v1695_v58 = vpop.f32.mrf.mxu0 }
 0x10d   :  { %v1366_v18 = vpop.eup %1365 }
 0x10e   :  { %v317_v19 = vadd.f32 1.0, %v1366_v18  ;;  %v1697_v59 = vpop.f32.mrf.mxu0 }
 0x110   :  { %1367 = vrcp.f32 %v317_v19 }
 0x11d   :  { %v1368_v20 = vpop.eup %1367 }
 0x11e   :  { %v321_v23 = vmul.f32 0.0, %v1368_v20 }
 0x17e   :  { %v324_v21 = vpop.permute.xlu0 %323 }
 0x17f   :  { %v326_v22 = vmul.f32 %v1368_v20, %v324_v21 }
 0x181   :  { %328 = vrot.lane.b32.xlu0 %v326_v22, %s1544_s3 }
 0x1f3   :  { %v329_v24 = vpop.permute.xlu0 %328 }
 0x1f4   :  { %v331_v25 = vadd.f32 %v329_v24, %v321_v23 }
 0x1f6   :  { %1369 = vtanh.f32 %v331_v25 }
 0x203   :  { %v1370_v26 = vpop.eup %1369 }
 0x204   :  { %334 = vrot.lane.b32.xlu1 %v1370_v26, %s1543_s17 }
 0x276   :  { %v335_v27 = vpop.permute.xlu1 %334 }
 0x277   :  { %v337_v28 = vmul.f32 %v1368_v20, %v335_v27  ;;  %v207_v20 = vadd.f32 %v1246_v54, %v1649_v10 }
 0x279   :  { %341 = vrot.lane.b32.xlu1 %v337_v28, %s1544_s3 }
 0x2eb   :  { %v342_v29 = vpop.permute.xlu1 %341 }
 0x2ec   :  { %1273 = vmatmul.mubr.msk.f32.vlgmr.msra.gmra.mxu1 %vm239_vm2, %v342_v29 }
 0x2ed   :  { %1287 = vmatpush3.msra.mxu1 %v1608_v2  ;;  %1294 = vmatprep.mubr.msk.f32.mxu1 %vm1542_vm0, %v1541_v0 }
 0x2ee   :  { %1288 = vmatprep.subr.mxu1 %v1541_v0 }
 0x2ef   :  { %1289 = vmatpush3.msra.mxu1 %v1611_v4 }
 0x2f0   :  { %1290 = vmatprep.subr.mxu1 %v1541_v0 }
 0x2f1   :  { %1291 = vmatpush3.msra.mxu1 %v1615_v7 }
 0x2f2   :  { %1292 = vmatprep.subr.mxu1 %v1541_v0 }
 0x2f3   :  { %1293 = vmatpush3.msra.mxu1 %v1620_v8 }
 0x2f4   :  { %1308 = vmatprep.subr.mxu1 %v1541_v0 }
 0x3ac   :  { %v411_v31 = vpop.f32.mrf.mxu1 }
 0x3ad   :  { %v415_v32 = vadd.f32 %v411_v31, %v197_v30 }
 0x3ae   :  { %v1274_v33 = vpop.f32.mrf.mxu1 }
 0x3af   :  { %1371 = vtanh.f32 %v415_v32  ;;  %v1167_v35 = vmul.f32 -1.442695, %v415_v32 }
 0x3b1   :  { %1373 = vpow2.f32 %v1167_v35 }
 0x3bc   :  { %v1372_v34 = vpop.eup %1371 }
 0x3bd   :  { %425 = vrot.lane.b32.xlu0 %v1372_v34, %s1543_s17 }
 0x3be   :  { %v1374_v36 = vpop.eup %1373 }
 0x3bf   :  { %v419_v37 = vadd.f32 1.0, %v1374_v36 }
 0x3c1   :  { %1375 = vrcp.f32 %v419_v37 }
 0x3ce   :  { %v1376_v38 = vpop.eup %1375 }
 0x3cf   :  { %v423_v41 = vmul.f32 %v1376_v38, %v331_v25 }
 0x42f   :  { %v426_v39 = vpop.permute.xlu0 %425 }
 0x430   :  { %v428_v40 = vmul.f32 %v1376_v38, %v426_v39 }
 0x432   :  { %430 = vrot.lane.b32.xlu1 %v428_v40, %s1544_s3 }
 0x4a4   :  { %v431_v42 = vpop.permute.xlu1 %430 }
 0x4a5   :  { %v433_v43 = vadd.f32 %v431_v42, %v423_v41 }
 0x4a7   :  { %1377 = vtanh.f32 %v433_v43 }
 0x4b4   :  { %v1378_v50 = vpop.eup %1377 }
 0x4b5   :  { %436 = vrot.lane.b32.xlu0 %v1378_v50, %s1543_s17 }
 0x527   :  { %v437_v51 = vpop.permute.xlu0 %436 }
 0x528   :  { %v439_v52 = vmul.f32 %v1376_v38, %v437_v51  ;;  %v212_v38 = vadd.f32 %v1649_v10, %v1693_v57  ;;  %v217_v57 = vadd.f32 %v1691_v56, %v1649_v10 }
 0x52a   :  { %443 = vrot.lane.b32.xlu1 %v439_v52, %s1544_s3 }
 0x59c   :  { %v444_v53 = vpop.permute.xlu1 %443 }
 0x59d   :  { %1284 = vmatmul.mubr.msk.f32.vlgmr.msra.gmra.mxu0 %vm239_vm2, %v444_v53 }
 0x59e   :  { %1298 = vmatpush3.msra.mxu0 %v1608_v2  ;;  %1305 = vmatprep.mubr.msk.f32.mxu0 %vm1542_vm0, %v1541_v0 }
 0x59f   :  { %1299 = vmatprep.subr.mxu0 %v1541_v0 }
 0x5a0   :  { %1300 = vmatpush3.msra.mxu0 %v1611_v4 }
 0x5a1   :  { %1301 = vmatprep.subr.mxu0 %v1541_v0 }
 0x5a2   :  { %1302 = vmatpush3.msra.mxu0 %v1615_v7 }
 0x5a3   :  { %1303 = vmatprep.subr.mxu0 %v1541_v0 }
 0x5a4   :  { %1304 = vmatpush3.msra.mxu0 %v1620_v8 }
 0x5a5   :  { %1319 = vmatprep.subr.mxu0 %v1541_v0 }
 0x65d   :  { %v513_v61 = vpop.f32.mrf.mxu0 }
 0x65e   :  { %v517_v62 = vadd.f32 %v513_v61, %v202_v60 }
 0x65f   :  { %v1285_v63 = vpop.f32.mrf.mxu0 }
 0x660   :  { %1379 = vtanh.f32 %v517_v62  ;;  %v1169_v3 = vmul.f32 -1.442695, %v517_v62 }
 0x662   :  { %1381 = vpow2.f32 %v1169_v3 }
 0x66d   :  { %v1380_v1 = vpop.eup %1379 }
 0x66e   :  { %527 = vrot.lane.b32.xlu0 %v1380_v1, %s1543_s17 }
 0x66f   :  { %v1382_v5 = vpop.eup %1381 }
 0x670   :  { %v521_v6 = vadd.f32 1.0, %v1382_v5 }
 0x672   :  { %1383 = vrcp.f32 %v521_v6 }
 0x67f   :  { %v1384_v9 = vpop.eup %1383 }
 0x680   :  { %v525_v13 = vmul.f32 %v1384_v9, %v433_v43 }
 0x6e0   :  { %v528_v11 = vpop.permute.xlu0 %527 }
 0x6e1   :  { %v530_v12 = vmul.f32 %v1384_v9, %v528_v11 }
 0x6e3   :  { %532 = vrot.lane.b32.xlu1 %v530_v12, %s1544_s3 }
 0x755   :  { %v533_v14 = vpop.permute.xlu1 %532 }
 0x756   :  { %v535_v15 = vadd.f32 %v533_v14, %v525_v13  ;;  %v222_v14 = vadd.f32 %v1649_v10, %v1697_v59 }
 0x758   :  { %1385 = vtanh.f32 %v535_v15 }
 0x765   :  { %v1386_v16 = vpop.eup %1385 }
 0x766   :  { %538 = vrot.lane.b32.xlu0 %v1386_v16, %s1543_s17 }
 0x7d8   :  { %v539_v17 = vpop.permute.xlu0 %538 }
 0x7d9   :  { %v541_v18 = vmul.f32 %v1384_v9, %v539_v17 }
 0x7db   :  { %545 = vrot.lane.b32.xlu1 %v541_v18, %s1544_s3 }
 0x84d   :  { %v546_v19 = vpop.permute.xlu1 %545 }
 0x84e   :  { %1295 = vmatmul.mubr.msk.f32.vlgmr.msra.gmra.mxu1 %vm239_vm2, %v546_v19 }
 0x84f   :  { %1309 = vmatpush3.msra.mxu1 %v1608_v2  ;;  %1316 = vmatprep.mubr.msk.f32.mxu1 %vm1542_vm0, %v1541_v0 }
 0x850   :  { %1310 = vmatprep.subr.mxu1 %v1541_v0 }
 0x851   :  { %1311 = vmatpush3.msra.mxu1 %v1611_v4 }
 0x852   :  { %1312 = vmatprep.subr.mxu1 %v1541_v0 }
 0x853   :  { %1313 = vmatpush3.msra.mxu1 %v1615_v7 }
 0x854   :  { %1314 = vmatprep.subr.mxu1 %v1541_v0 }
 0x855   :  { %1315 = vmatpush3.msra.mxu1 %v1620_v8 }
 0x856   :  { %1330 = vmatprep.subr.mxu1 %v1541_v0 }
 0x90e   :  { %v615_v21 = vpop.f32.mrf.mxu1 }
 0x90f   :  { %v619_v22 = vadd.f32 %v615_v21, %v207_v20 }
 0x910   :  { %v1296_v23 = vpop.f32.mrf.mxu1 }
 0x911   :  { %1387 = vtanh.f32 %v619_v22  ;;  %v1171_v25 = vmul.f32 -1.442695, %v619_v22 }
 0x913   :  { %1389 = vpow2.f32 %v1171_v25 }
 0x91e   :  { %v1388_v24 = vpop.eup %1387 }
 0x91f   :  { %629 = vrot.lane.b32.xlu0 %v1388_v24, %s1543_s17 }
 0x920   :  { %v1390_v26 = vpop.eup %1389 }
 0x921   :  { %v623_v27 = vadd.f32 1.0, %v1390_v26 }
 0x923   :  { %1391 = vrcp.f32 %v623_v27 }
 0x930   :  { %v1392_v28 = vpop.eup %1391 }
 0x931   :  { %v627_v31 = vmul.f32 %v1392_v28, %v535_v15 }
 0x991   :  { %v630_v29 = vpop.permute.xlu0 %629 }
 0x992   :  { %v632_v30 = vmul.f32 %v1392_v28, %v630_v29 }
 0x994   :  { %634 = vrot.lane.b32.xlu1 %v632_v30, %s1544_s3 }
 0xa06   :  { %v635_v32 = vpop.permute.xlu1 %634 }
 0xa07   :  { %v637_v33 = vadd.f32 %v635_v32, %v627_v31  ;;  %v227_v31 = vadd.f32 %v1695_v58, %v1649_v10  ;;  %v1055_v58 = vld [vmem:[#allocation9 + $0x18] sm:$0xff] }
 0xa09   :  { %1393 = vtanh.f32 %v637_v33 }
 0xa16   :  { %v1394_v34 = vpop.eup %1393 }
 0xa17   :  { %640 = vrot.lane.b32.xlu0 %v1394_v34, %s1543_s17 }
 0xa89   :  { %v641_v35 = vpop.permute.xlu0 %640 }
 0xa8a   :  { %v643_v36 = vmul.f32 %v1392_v28, %v641_v35 }
 0xa8c   :  { %647 = vrot.lane.b32.xlu1 %v643_v36, %s1544_s3 }
 0xafe   :  { %v648_v37 = vpop.permute.xlu1 %647 }
 0xaff   :  { %1306 = vmatmul.mubr.msk.f32.vlgmr.msra.gmra.mxu0 %vm239_vm2, %v648_v37 }
 0xb00   :  { %1320 = vmatpush3.msra.mxu0 %v1608_v2  ;;  %1327 = vmatprep.mubr.msk.f32.mxu0 %vm1542_vm0, %v1541_v0 }
 0xb01   :  { %1321 = vmatprep.subr.mxu0 %v1541_v0 }
 0xb02   :  { %1322 = vmatpush3.msra.mxu0 %v1611_v4 }
 0xb03   :  { %1323 = vmatprep.subr.mxu0 %v1541_v0 }
 0xb04   :  { %1324 = vmatpush3.msra.mxu0 %v1615_v7 }
 0xb05   :  { %1325 = vmatprep.subr.mxu0 %v1541_v0 }
 0xb06   :  { %1326 = vmatpush3.msra.mxu0 %v1620_v8 }
 0xb07   :  { %1341 = vmatprep.subr.mxu0 %v1541_v0 }
 0xbbf   :  { %v717_v39 = vpop.f32.mrf.mxu0 }
 0xbc0   :  { %v721_v40 = vadd.f32 %v717_v39, %v212_v38 }
 0xbc1   :  { %v1307_v41 = vpop.f32.mrf.mxu0 }
 0xbc2   :  { %1395 = vtanh.f32 %v721_v40  ;;  %v1173_v43 = vmul.f32 -1.442695, %v721_v40 }
 0xbc4   :  { %1397 = vpow2.f32 %v1173_v43 }
 0xbcf   :  { %v1396_v42 = vpop.eup %1395 }
 0xbd0   :  { %731 = vrot.lane.b32.xlu0 %v1396_v42, %s1543_s17 }
 0xbd1   :  { %v1398_v44 = vpop.eup %1397 }
 0xbd2   :  { %v725_v45 = vadd.f32 1.0, %v1398_v44  ;;  %v1054_v44 = vld [vmem:[#allocation9 + $0x10] sm:$0xff] }
 0xbd4   :  { %1399 = vrcp.f32 %v725_v45  ;;  %v1053_v45 = vld [vmem:[#allocation9 + $0x8] sm:$0xff] }
 0xbe1   :  { %v1400_v46 = vpop.eup %1399 }
 0xbe2   :  { %v729_v49 = vmul.f32 %v1400_v46, %v637_v33 }
 0xc42   :  { %v732_v47 = vpop.permute.xlu0 %731 }
 0xc43   :  { %v734_v48 = vmul.f32 %v1400_v46, %v732_v47 }
 0xc45   :  { %736 = vrot.lane.b32.xlu1 %v734_v48, %s1544_s3 }
 0xcb7   :  { %v737_v50 = vpop.permute.xlu1 %736 }
 0xcb8   :  { %v739_v51 = vadd.f32 %v737_v50, %v729_v49 }
 0xcba   :  { %1401 = vtanh.f32 %v739_v51 }
 0xcc7   :  { %v1402_v52 = vpop.eup %1401 }
 0xcc8   :  { %742 = vrot.lane.b32.xlu0 %v1402_v52, %s1543_s17 }
 0xd3a   :  { %v743_v53 = vpop.permute.xlu0 %742 }
 0xd3b   :  { %v745_v54 = vmul.f32 %v1400_v46, %v743_v53  ;;  %v1052_v46 = vld [vmem:[#allocation9] sm:$0xff] }
 0xd3d   :  { %749 = vrot.lane.b32.xlu1 %v745_v54, %s1544_s3 }
 0xdaf   :  { %v750_v55 = vpop.permute.xlu1 %749 }
 0xdb0   :  { %1317 = vmatmul.mubr.msk.f32.vlgmr.msra.gmra.mxu1 %vm239_vm2, %v750_v55 }
 0xdb1   :  { %1331 = vmatpush3.msra.mxu1 %v1608_v2  ;;  %1338 = vmatprep.mubr.msk.f32.mxu1 %vm1542_vm0, %v1541_v0 }
 0xdb2   :  { %1332 = vmatprep.subr.mxu1 %v1541_v0 }
 0xdb3   :  { %1333 = vmatpush3.msra.mxu1 %v1611_v4 }
 0xdb4   :  { %1334 = vmatprep.subr.mxu1 %v1541_v0 }
 0xdb5   :  { %1335 = vmatpush3.msra.mxu1 %v1615_v7 }
 0xdb6   :  { %1336 = vmatprep.subr.mxu1 %v1541_v0 }
 0xdb7   :  { %1337 = vmatpush3.msra.mxu1 %v1620_v8 }
 0xe70   :  { %v819_v60 = vpop.f32.mrf.mxu1 }
 0xe71   :  { %v823_v2 = vadd.f32 %v819_v60, %v217_v57 }
 0xe72   :  { %v1318_v61 = vpop.f32.mrf.mxu1 }
 0xe73   :  { %1403 = vtanh.f32 %v823_v2  ;;  %v1175_v63 = vmul.f32 -1.442695, %v823_v2 }
 0xe75   :  { %1405 = vpow2.f32 %v1175_v63 }
 0xe80   :  { %v1404_v62 = vpop.eup %1403 }
 0xe81   :  { %833 = vrot.lane.b32.xlu0 %v1404_v62, %s1543_s17 }
 0xe82   :  { %v1406_v4 = vpop.eup %1405 }
 0xe83   :  { %v827_v1 = vadd.f32 1.0, %v1406_v4 }
 0xe85   :  { %1407 = vrcp.f32 %v827_v1 }
 0xe92   :  { %v1408_v7 = vpop.eup %1407 }
 0xe93   :  { %v831_v8 = vmul.f32 %v1408_v7, %v739_v51  ;;  %v1180_v51 = vld [vmem:[%s1784_s5] ss:$0 sm:$0xff] }
 0xef3   :  { %v834_v3 = vpop.permute.xlu0 %833 }
 0xef4   :  { %v836_v5 = vmul.f32 %v1408_v7, %v834_v3 }
 0xef6   :  { %838 = vrot.lane.b32.xlu1 %v836_v5, %s1544_s3 }
 0xf68   :  { %v839_v6 = vpop.permute.xlu1 %838 }
 0xf69   :  { %v841_v56 = vadd.f32 %v839_v6, %v831_v8 }
 0xf6b   :  { %1409 = vtanh.f32 %v841_v56 }
 0xf78   :  { %v1410_v9 = vpop.eup %1409 }
 0xf79   :  { %844 = vrot.lane.b32.xlu0 %v1410_v9, %s1543_s17 }
 0xfeb   :  { %v845_v11 = vpop.permute.xlu0 %844 }
 0xfec   :  { %v847_v12 = vmul.f32 %v1408_v7, %v845_v11 }
 0xfee   :  { %851 = vrot.lane.b32.xlu1 %v847_v12, %s1544_s3 }
0x1060   :  { %v852_v13 = vpop.permute.xlu1 %851 }
0x1061   :  { %1328 = vmatmul.mubr.msk.f32.vlgmr.msra.gmra.mxu0 %vm239_vm2, %v852_v13 }
0x1062   :  { %1349 = vmatprep.mubr.msk.f32.mxu0 %vm1542_vm0, %v1541_v0  ;;  %1342 = vmatpush3.msra.mxu0 %v1055_v58 }
0x1063   :  { %1343 = vmatprep.subr.mxu0 %v1541_v0 }
0x1064   :  { %1344 = vmatpush3.msra.mxu0 %v1054_v44 }
0x1065   :  { %1345 = vmatprep.subr.mxu0 %v1541_v0 }
0x1066   :  { %1346 = vmatpush3.msra.mxu0 %v1053_v45 }
0x1067   :  { %1347 = vmatprep.subr.mxu0 %v1541_v0 }
0x1068   :  { %1348 = vmatpush3.msra.mxu0 %v1052_v46 }
0x1121   :  { %v921_v15 = vpop.f32.mrf.mxu0 }
0x1122   :  { %v925_v16 = vadd.f32 %v921_v15, %v222_v14 }
0x1123   :  { %v1329_v17 = vpop.f32.mrf.mxu0 }
0x1124   :  { %1411 = vtanh.f32 %v925_v16  ;;  %v1177_v19 = vmul.f32 -1.442695, %v925_v16 }
0x1126   :  { %1413 = vpow2.f32 %v1177_v19 }
0x1131   :  { %v1412_v18 = vpop.eup %1411 }
0x1132   :  { %935 = vrot.lane.b32.xlu0 %v1412_v18, %s1543_s17 }
0x1133   :  { %v1414_v20 = vpop.eup %1413 }
0x1134   :  { %v929_v21 = vadd.f32 1.0, %v1414_v20 }
0x1136   :  { %1415 = vrcp.f32 %v929_v21 }
0x1143   :  { %v1416_v22 = vpop.eup %1415 }
0x1144   :  { %v933_v25 = vmul.f32 %v1416_v22, %v841_v56 }
0x11a4   :  { %v936_v23 = vpop.permute.xlu0 %935 }
0x11a5   :  { %v938_v24 = vmul.f32 %v1416_v22, %v936_v23 }
0x11a7   :  { %940 = vrot.lane.b32.xlu1 %v938_v24, %s1544_s3 }
0x1219   :  { %v941_v26 = vpop.permute.xlu1 %940 }
0x121a   :  { %v943_v59 = vadd.f32 %v941_v26, %v933_v25 }
0x121c   :  { %1417 = vtanh.f32 %v943_v59 }
0x1229   :  { %v1418_v27 = vpop.eup %1417 }
0x122a   :  { %946 = vrot.lane.b32.xlu0 %v1418_v27, %s1543_s17 }
0x129c   :  { %v947_v28 = vpop.permute.xlu0 %946 }
0x129d   :  { %v949_v29 = vmul.f32 %v1416_v22, %v947_v28 }
0x129f   :  { %953 = vrot.lane.b32.xlu1 %v949_v29, %s1544_s3 }
0x1311   :  { %v954_v30 = vpop.permute.xlu1 %953 }
0x1312   :  { %1339 = vmatmul.mubr.msk.f32.vlgmr.msra.gmra.mxu1 %vm239_vm2, %v954_v30 }
0x13d2   :  { %v1023_v32 = vpop.f32.mrf.mxu1 }
0x13d3   :  { %v1027_v33 = vadd.f32 %v1023_v32, %v227_v31 }
0x13d4   :  { %v1340_v34 = vpop.f32.mrf.mxu1 }
0x13d5   :  { %1419 = vtanh.f32 %v1027_v33  ;;  %v1179_v36 = vmul.f32 -1.442695, %v1027_v33 }
0x13d7   :  { %1421 = vpow2.f32 %v1179_v36 }
0x13e2   :  { %v1420_v35 = vpop.eup %1419 }
0x13e3   :  { %1037 = vrot.lane.b32.xlu0 %v1420_v35, %s1543_s17 }
0x13e4   :  { %v1422_v37 = vpop.eup %1421 }
0x13e5   :  { %v1031_v38 = vadd.f32 1.0, %v1422_v37 }
0x13e7   :  { %1423 = vrcp.f32 %v1031_v38 }
0x13f4   :  { %v1424_v39 = vpop.eup %1423 }
0x13f5   :  { %v1035_v42 = vmul.f32 %v1424_v39, %v943_v59 }
0x1455   :  { %v1038_v40 = vpop.permute.xlu0 %1037 }
0x1456   :  { %v1040_v41 = vmul.f32 %v1424_v39, %v1038_v40 }
0x1458   :  { %1042 = vrot.lane.b32.xlu1 %v1040_v41, %s1544_s3 }
0x14ca   :  { %v1043_v43 = vpop.permute.xlu1 %1042 }
0x14cb   :  { %v1045_v10 = vadd.f32 %v1043_v43, %v1035_v42 }
0x14cd   :  { %1425 = vtanh.f32 %v1045_v10 }
0x14da   :  { %v1426_v47 = vpop.eup %1425 }
0x14db   :  { %1048 = vrot.lane.b32.xlu0 %v1426_v47, %s1543_s17 }
0x154d   :  { %v1049_v48 = vpop.permute.xlu0 %1048 }
0x154e   :  { %v1051_v49 = vmul.f32 %v1424_v39, %v1049_v48 }
0x1550   :  { %1064 = vrot.lane.b32.xlu1 %v1051_v49, %s1544_s3 }
0x15c2   :  { %v1065_v50 = vpop.permute.xlu1 %1064 }
0x15c3   :  { %1350 = vmatmul.mubr.msk.f32.vlgmr.msra.gmra.mxu0 %vm239_vm2, %v1065_v50 }
0x1683   :  { %v1134_v52 = vpop.f32.mrf.mxu0 }
0x1684   :  { %v1135_v53 = vadd.f32 %v1180_v51, %v1134_v52 }
0x1685   :  { %v1351_v0 = vpop.f32.mrf.mxu0 }
0x1686   :  { %1138 = vst [vmem:[#allocation11] sm:$0xff] %v1135_v53 }
0x1687   :  { %1518 = shalt.err (!%p1515_p10)
}
0x1688   :  { %1148 = dma.vmem_to_hbm [thread:$0]  %s1146_s21, 128, %s1785_s6, [#allocation5]  }
0x1689   :  { %1533 = dma.done.wait [#allocation5], 128  }
0x168a   :  { %1534 = vsyncadd [#allocation5], 4294967168 }
0x168b   :  { %1152 = vsyncpa [#allocation4], 1 }
0x168c   :  { %1153 = vsyncpa [#allocation7], 1 }
0x168d   :  { %1154 = vsyncpa [#allocation10], 1 }
0x168e   :  { %1155 = vsyncpa [#allocation5], 1 }

</bundles_post_ra>
